<compile_context>
chip_gen: v5e
topology: v5e:2x2
jax: 0.10.0
libtpu: 0.0.40
codegen_flags: <defaults>
</compile_context>

<pallas_src>
import jax
import jax.numpy as jnp
from jax.experimental import pallas as pl
from jax.experimental.pallas import tpu as pltpu

HIDDEN = 64        # logical fc1/fc2 width from the module definition
LANE = 128         # TPU lane width; hidden dim zero-padded to this
SUBLANE = 16       # bf16 sublane packing -> batch tiles are multiples of 16
TB_TARGET = 4096   # default batch-tile target (HBM-bound: big tiles amortize
                   # the ~0.35us per-grid-step overhead)
TB_CAP = 8192      # keeps double-buffered tiles + f32 intermediates well
                   # inside the 32 MiB scoped-VMEM limit set below


def _round_up(n, m):
    return ((n + m - 1) // m) * m


def _cdiv(a, b):
    return -(-a // b)


def _tensorcores_per_chip():
    """Best-effort TensorCores-per-chip (2 on v7x, 1 on v5e/v6e)."""
    try:
        kind = jax.devices()[0].device_kind.lower()
    except Exception:
        return 1
    return 2 if "7" in kind else 1


def _mlp_kernel(x_ref, w1_ref, b1_ref, w2_ref, b2_ref, w3_ref, b3_ref, o_ref):
    # Whole 3-layer MLP hot path in one kernel: matmul -> bias -> ReLU (x2),
    # then the final linear layer.  Matmuls accumulate in f32 on the MXU
    # (operands in the weights' dtype, e.g. bf16); bias-add / ReLU stay f32.
    wdt = w1_ref.dtype
    x = x_ref[...].astype(wdt)  # cast inside the kernel (no wrapper pass)
    h1 = jnp.dot(x, w1_ref[...], preferred_element_type=jnp.float32) + b1_ref[...]
    h1 = jnp.maximum(h1, 0.0)
    h2 = (
        jnp.dot(h1.astype(wdt), w2_ref[...], preferred_element_type=jnp.float32)
        + b2_ref[...]
    )
    h2 = jnp.maximum(h2, 0.0)
    o_ref[...] = (
        jnp.dot(h2.astype(wdt), w3_ref[...], preferred_element_type=jnp.float32)
        + b3_ref[...]
    ).astype(o_ref.dtype)


def prepare_params(params, compute_dtype=jnp.bfloat16):
    """One-time weight padding + cast (hoisted out of the per-call path).

    Hidden dim (64) is zero-padded to 128 lanes so intermediate activations
    are lane-dense; the final layer's output dim is left unpadded so the
    kernel's HBM writeback stays at the real out_size. Biases stay f32.
    """
    w1, b1, w2, b2, w3, b3 = params
    in_size = w1.shape[0]
    out_size = w3.shape[1]
    cdt = jnp.dtype(compute_dtype)
    h_pad = _round_up(HIDDEN, LANE)  # 64 -> 128

    w1_p = jnp.zeros((in_size, h_pad), cdt).at[:, :HIDDEN].set(w1.astype(cdt))
    w2_p = jnp.zeros((h_pad, h_pad), cdt).at[:HIDDEN, :HIDDEN].set(w2.astype(cdt))
    w3_p = jnp.zeros((h_pad, out_size), cdt).at[:HIDDEN, :].set(w3.astype(cdt))
    b1_p = jnp.zeros((1, h_pad), jnp.float32).at[:, :HIDDEN].set(b1.astype(jnp.float32))
    b2_p = jnp.zeros((1, h_pad), jnp.float32).at[:, :HIDDEN].set(b2.astype(jnp.float32))
    b3_p = b3.astype(jnp.float32)
    return (w1_p, b1_p, w2_p, b2_p, w3_p, b3_p)


def gradient_predictor_forward(x, prepared_params, *, tb_target=TB_TARGET):
    """Pallas forward pass of GradientPredictor.

    x: [B, input_size] float32 (cast to the compute dtype inside the kernel)
    prepared_params: output of `prepare_params` (padded/cast once at init)
    tb_target: requested batch tile; actual tile is derived remainder-aware.
    """
    w1_p, b1_p, w2_p, b2_p, w3_p, b3_p = prepared_params
    B, in_size = x.shape
    h_pad = w1_p.shape[1]
    out_size = w3_p.shape[1]
    x = x.astype(jnp.float32)

    # --- batch tiling: derive the tile from the block count ----------------
    num_tc = _tensorcores_per_chip()
    num_blocks = max(1, _cdiv(B, tb_target))
    if num_tc > 1:
        # Multi-TC (v7x): aim for >= 2 grid steps per TensorCore so each core
        # keeps DMA/compute overlap, but never shrink a block below 16 rows.
        num_blocks = max(num_blocks, min(2 * num_tc, _cdiv(B, SUBLANE)))
    tb_eff = min(_round_up(_cdiv(B, num_blocks), SUBLANE), TB_CAP)
    num_blocks = _cdiv(B, tb_eff)
    b_pad = num_blocks * tb_eff

    # Pad the batch only when B isn't already a multiple of the tile.
    if b_pad == B:
        x_p = x
    else:
        x_p = jnp.zeros((b_pad, in_size), x.dtype).at[:B].set(x)

    grid = (num_blocks,)
    in_specs = [
        pl.BlockSpec((tb_eff, in_size), lambda i: (i, 0)),   # x  (batch-tiled)
        pl.BlockSpec((in_size, h_pad), lambda i: (0, 0)),    # w1 (broadcast)
        pl.BlockSpec((1, h_pad), lambda i: (0, 0)),          # b1
        pl.BlockSpec((h_pad, h_pad), lambda i: (0, 0)),      # w2
        pl.BlockSpec((1, h_pad), lambda i: (0, 0)),          # b2
        pl.BlockSpec((h_pad, out_size), lambda i: (0, 0)),   # w3 (unpadded N)
        pl.BlockSpec((1, out_size), lambda i: (0, 0)),       # b3
    ]
    out_specs = pl.BlockSpec((tb_eff, out_size), lambda i: (i, 0))

    wsize = jnp.dtype(w1_p.dtype).itemsize
    weight_elems = in_size * h_pad + h_pad * h_pad + h_pad * out_size
    cost = pl.CostEstimate(
        flops=2 * b_pad * weight_elems,
        transcendentals=0,
        bytes_accessed=(
            b_pad * in_size * 4            # x in (f32)
            + b_pad * out_size * 4         # out (f32, unpadded)
            + weight_elems * wsize         # weights
            + (2 * h_pad + out_size) * 4   # biases (f32)
        ),
    )

    out = pl.pallas_call(
        _mlp_kernel,
        out_shape=jax.ShapeDtypeStruct((b_pad, out_size), jnp.float32),
        grid=grid,
        in_specs=in_specs,
        out_specs=out_specs,
        compiler_params=pltpu.CompilerParams(
            dimension_semantics=("parallel",),
            vmem_limit_bytes=32 * 1024 * 1024,
        ),
        cost_estimate=cost,
    )(x_p, w1_p, b1_p, w2_p, b2_p, w3_p, b3_p)

    # Only strip batch padding (no padded output columns exist any more).
    return out if b_pad == B else out[:B]


def init_params(key, input_size, output_size):
    """Deterministic init mimicking nn.Linear's U(-1/sqrt(fan_in), 1/sqrt(fan_in))."""
    ks = jax.random.split(key, 6)

    def linear(kw, kb, fan_in, fan_out):
        bound = 1.0 / jnp.sqrt(jnp.float32(fan_in))
        w = jax.random.uniform(kw, (fan_in, fan_out), jnp.float32, -bound, bound)
        b = jax.random.uniform(kb, (1, fan_out), jnp.float32, -bound, bound)
        return w, b

    w1, b1 = linear(ks[0], ks[1], input_size, HIDDEN)
    w2, b2 = linear(ks[2], ks[3], HIDDEN, HIDDEN)
    w3, b3 = linear(ks[4], ks[5], HIDDEN, output_size)
    return (w1, b1, w2, b2, w3, b3)


def reference_forward(x, params):
    w1, b1, w2, b2, w3, b3 = params
    h1 = jnp.maximum(x @ w1 + b1, 0.0)
    h2 = jnp.maximum(h1 @ w2 + b2, 0.0)
    return h2 @ w3 + b3


if __name__ == "__main__":
    key = jax.random.PRNGKey(0)
    kx, kp = jax.random.split(key)

    batch = 8
    input_size = 32   # stands in for X_train.shape[1]
    output_size = 16  # stands in for y_train.shape[1]

    x = jax.random.normal(kx, (batch, input_size), jnp.float32)
    params = init_params(kp, input_size, output_size)
    ref = reference_forward(x, params)

    # Exact path: f32 MXU operands -> matches the f32 reference tightly.
    p_f32 = prepare_params(params, compute_dtype=jnp.float32)
    out_f32 = jax.block_until_ready(gradient_predictor_forward(x, p_f32))
    assert out_f32.shape == (batch, output_size)
    assert jnp.allclose(out_f32, ref, atol=1e-5, rtol=1e-5), "f32 path mismatch"

    # Fast path: bf16 MXU operands with f32 accumulation (looser tolerance).
    p_bf16 = prepare_params(params, compute_dtype=jnp.bfloat16)
    out_bf16 = jax.block_until_ready(gradient_predictor_forward(x, p_bf16))
    assert out_bf16.shape == (batch, output_size)
    assert jnp.allclose(out_bf16, ref, atol=5e-2, rtol=5e-2), "bf16 path mismatch"

    # Ragged / multi-block batch: exercises grid > 1 and batch-row padding.
    batch2 = 200
    x2 = jax.random.normal(kx, (batch2, input_size), jnp.float32)
    ref2 = reference_forward(x2, params)
    out2 = jax.block_until_ready(
        gradient_predictor_forward(x2, p_f32, tb_target=64)
    )
    assert out2.shape == (batch2, output_size)
    assert jnp.allclose(out2, ref2, atol=1e-5, rtol=1e-5), "multi-block mismatch"

    print("KERNEL_OK")
</pallas_src>

<mosaic_0001>
module attributes {stable_mosaic.version = 11 : i64} {
  func.func @_mlp_kernel(%arg0: i32, %arg1: memref<16x32xf32, #tpu.memory_space<vmem>>, %arg2: memref<32x128xf32, #tpu.memory_space<vmem>>, %arg3: memref<1x128xf32, #tpu.memory_space<vmem>>, %arg4: memref<128x128xf32, #tpu.memory_space<vmem>>, %arg5: memref<1x128xf32, #tpu.memory_space<vmem>>, %arg6: memref<128x16xf32, #tpu.memory_space<vmem>>, %arg7: memref<1x16xf32, #tpu.memory_space<vmem>>, %arg8: memref<16x16xf32, #tpu.memory_space<vmem>>) attributes {dimension_semantics = [#tpu.dimension_semantics<parallel>], iteration_bounds = array<i64: 1>, scalar_prefetch = 0 : i64, scratch_operands = 0 : i64, tpu.core_type = #tpu.core_type<tc>, window_params = [{transform_indices = @transform_0, window_bounds = array<i64: 16, 32>}, {pipeline_mode = #tpu.pipeline_mode<synchronous>, transform_indices = @transform_1, window_bounds = array<i64: 32, 128>}, {pipeline_mode = #tpu.pipeline_mode<synchronous>, transform_indices = @transform_2, window_bounds = array<i64: 1, 128>}, {pipeline_mode = #tpu.pipeline_mode<synchronous>, transform_indices = @transform_3, window_bounds = array<i64: 128, 128>}, {pipeline_mode = #tpu.pipeline_mode<synchronous>, transform_indices = @transform_4, window_bounds = array<i64: 1, 128>}, {pipeline_mode = #tpu.pipeline_mode<synchronous>, transform_indices = @transform_5, window_bounds = array<i64: 128, 16>}, {pipeline_mode = #tpu.pipeline_mode<synchronous>, transform_indices = @transform_6, window_bounds = array<i64: 1, 16>}, {transform_indices = @transform_7, window_bounds = array<i64: 16, 16>}]} {
    %c0 = arith.constant 0 : index
    %c0_0 = arith.constant 0 : index
    %0 = vector.load %arg1[%c0, %c0_0] : memref<16x32xf32, #tpu.memory_space<vmem>>, vector<16x32xf32>
    %c0_1 = arith.constant 0 : index
    %c0_2 = arith.constant 0 : index
    %1 = vector.load %arg2[%c0_1, %c0_2] : memref<32x128xf32, #tpu.memory_space<vmem>>, vector<32x128xf32>
    %cst = arith.constant dense<0.000000e+00> : vector<16x128xf32>
    %2 = tpu.matmul %0, %1, %cst {dimension_numbers = #tpu.dot_dimension_numbers<[1], [0], [0], [1], [0, 0, 1, 1], [], []>} : vector<16x32xf32>, vector<32x128xf32>, vector<16x128xf32> -> vector<16x128xf32>
    %c0_3 = arith.constant 0 : index
    %c0_4 = arith.constant 0 : index
    %3 = vector.load %arg3[%c0_3, %c0_4] : memref<1x128xf32, #tpu.memory_space<vmem>>, vector<1x128xf32>
    %4 = vector.broadcast %3 : vector<1x128xf32> to vector<16x128xf32>
    %5 = arith.addf %2, %4 : vector<16x128xf32>
    %cst_5 = arith.constant 0.000000e+00 : f32
    %6 = vector.broadcast %cst_5 : f32 to vector<16x128xf32>
    %7 = arith.maximumf %5, %6 : vector<16x128xf32>
    %c0_6 = arith.constant 0 : index
    %c0_7 = arith.constant 0 : index
    %8 = vector.load %arg4[%c0_6, %c0_7] : memref<128x128xf32, #tpu.memory_space<vmem>>, vector<128x128xf32>
    %cst_8 = arith.constant dense<0.000000e+00> : vector<16x128xf32>
    %9 = tpu.matmul %7, %8, %cst_8 {dimension_numbers = #tpu.dot_dimension_numbers<[1], [0], [0], [1], [0, 0, 1, 1], [], []>} : vector<16x128xf32>, vector<128x128xf32>, vector<16x128xf32> -> vector<16x128xf32>
    %c0_9 = arith.constant 0 : index
    %c0_10 = arith.constant 0 : index
    %10 = vector.load %arg5[%c0_9, %c0_10] : memref<1x128xf32, #tpu.memory_space<vmem>>, vector<1x128xf32>
    %11 = vector.broadcast %10 : vector<1x128xf32> to vector<16x128xf32>
    %12 = arith.addf %9, %11 : vector<16x128xf32>
    %cst_11 = arith.constant 0.000000e+00 : f32
    %13 = vector.broadcast %cst_11 : f32 to vector<16x128xf32>
    %14 = arith.maximumf %12, %13 : vector<16x128xf32>
    %c0_12 = arith.constant 0 : index
    %c0_13 = arith.constant 0 : index
    %15 = vector.load %arg6[%c0_12, %c0_13] : memref<128x16xf32, #tpu.memory_space<vmem>>, vector<128x16xf32>
    %cst_14 = arith.constant dense<0.000000e+00> : vector<16x16xf32>
    %16 = tpu.matmul %14, %15, %cst_14 {dimension_numbers = #tpu.dot_dimension_numbers<[1], [0], [0], [1], [0, 0, 1, 1], [], []>} : vector<16x128xf32>, vector<128x16xf32>, vector<16x16xf32> -> vector<16x16xf32>
    %c0_15 = arith.constant 0 : index
    %c0_16 = arith.constant 0 : index
    %17 = vector.load %arg7[%c0_15, %c0_16] : memref<1x16xf32, #tpu.memory_space<vmem>>, vector<1x16xf32>
    %18 = vector.broadcast %17 : vector<1x16xf32> to vector<16x16xf32>
    %19 = arith.addf %16, %18 : vector<16x16xf32>
    %c0_17 = arith.constant 0 : index
    %c0_18 = arith.constant 0 : index
    %20 = vector.load %arg8[%c0_17, %c0_18] : memref<16x16xf32, #tpu.memory_space<vmem>>, vector<16x16xf32>
    tpu.vector_store %arg8[%c0_17, %c0_18], %19 {strides = array<i32>} : memref<16x16xf32, #tpu.memory_space<vmem>>, vector<16x16xf32>,
    return
  }
  func.func @transform_0(%arg0: i32) -> (i32, i32) {
    %c0_i32 = arith.constant 0 : i32
    %c0_i32_0 = arith.constant 0 : i32
    return %arg0, %c0_i32 : i32, i32
  }
  func.func @transform_1(%arg0: i32) -> (i32, i32) {
    %c0_i32 = arith.constant 0 : i32
    %c0_i32_0 = arith.constant 0 : i32
    %c0_i32_1 = arith.constant 0 : i32
    return %c0_i32, %c0_i32_0 : i32, i32
  }
  func.func @transform_2(%arg0: i32) -> (i32, i32) {
    %c0_i32 = arith.constant 0 : i32
    %c0_i32_0 = arith.constant 0 : i32
    %c0_i32_1 = arith.constant 0 : i32
    return %c0_i32, %c0_i32_0 : i32, i32
  }
  func.func @transform_3(%arg0: i32) -> (i32, i32) {
    %c0_i32 = arith.constant 0 : i32
    %c0_i32_0 = arith.constant 0 : i32
    %c0_i32_1 = arith.constant 0 : i32
    return %c0_i32, %c0_i32_0 : i32, i32
  }
  func.func @transform_4(%arg0: i32) -> (i32, i32) {
    %c0_i32 = arith.constant 0 : i32
    %c0_i32_0 = arith.constant 0 : i32
    %c0_i32_1 = arith.constant 0 : i32
    return %c0_i32, %c0_i32_0 : i32, i32
  }
  func.func @transform_5(%arg0: i32) -> (i32, i32) {
    %c0_i32 = arith.constant 0 : i32
    %c0_i32_0 = arith.constant 0 : i32
    %c0_i32_1 = arith.constant 0 : i32
    return %c0_i32, %c0_i32_0 : i32, i32
  }
  func.func @transform_6(%arg0: i32) -> (i32, i32) {
    %c0_i32 = arith.constant 0 : i32
    %c0_i32_0 = arith.constant 0 : i32
    %c0_i32_1 = arith.constant 0 : i32
    return %c0_i32, %c0_i32_0 : i32, i32
  }
  func.func @transform_7(%arg0: i32) -> (i32, i32) {
    %c0_i32 = arith.constant 0 : i32
    %c0_i32_0 = arith.constant 0 : i32
    return %arg0, %c0_i32 : i32, i32
  }
}

</mosaic_0001>

<bundles_post_ra>
// kernel: tpu_custom_call.1
= control target key start
LH: loop header
LB: loop body
LE: loop exit
PB: predicated region body
PF: predicated region fallthrough
CT: control target
= control target key end

     0   :  { %12 = vsyncpa [#allocation3], 0  ;;  %s441_s0 = inlined_call_operand.vmem [shape: f32[16,32], index: 0, kind: input, shape index: {}]   ;;  %s442_s1 = inlined_call_operand.hbm [shape: f32[32,128], index: 1, kind: input, shape index: {}]   ;;  %s443_s2 = inlined_call_operand.vmem [shape: f32[1,128], index: 2, kind: input, shape index: {}]   ;;  %s444_s3 = inlined_call_operand.vmem [shape: f32[128,128], index: 3, kind: input, shape index: {}]   ;;  %s445_s4 = inlined_call_operand.vmem [shape: f32[1,128], index: 4, kind: input, shape index: {}]   ;;  %s446_s5 = inlined_call_operand.vmem [shape: f32[128,16], index: 5, kind: input, shape index: {}]   ;;  %s447_s6 = inlined_call_operand.vmem [shape: f32[1,16], index: 6, kind: input, shape index: {}]   ;;  %s448_s7 = inlined_call_operand.hbm [shape: f32[16,16], index: 7, kind: output, shape index: {}]  }
   0x1   :  { %13 = vsyncpa [#allocation4], 0  ;;  %s20_s26 = sshll.u32 %s442_s1, 4  ;;  %s272_s27 = smov [#allocation2]   ;;  %s21_s26 = int_to_ptr.hbm [resolvable:$true] %s20_s26 }
   0x2   :  { %s22_s28 = sshll.u32 %s272_s27, 4  ;;  %s273_s29 = smov 128   ;;  %s23_s28 = int_to_ptr.vmem [resolvable:$true] %s22_s28 }
   0x3   :  { %s274_s30 = smov 8  }
   0x4   :  { %28 = dma.hbm_to_vmem [thread:$0]  %s21_s26, 512, %s23_s28, [#allocation3], %s273_s29, %s273_s29, %s274_s30  }
   0x5   :  { %268 = dma.done.wait [#allocation3], 512  }
   0x6   :  { %269 = vsyncadd [#allocation3], 4294966784  ;;  %v48_v0 = vld [vmem:[#allocation2 + $0x18] sm:$0xff]  ;;  %v47_v1 = vld [vmem:[#allocation2 + $0x10] sm:$0xff]  ;;  %vm53_vm0 = vcmask 261120   ;;  %vm173_vm1 = vcmask 130048  }
   0x7   :  { %72 = vmatpush.msra.mxu0 %v48_v0  ;;  %v46_v2 = vld [vmem:[#allocation2 + $0x8] sm:$0xff]  ;;  %v100_v3 = vld [vmem:[%s444_s3 + $0x78] sm:$0xff]  ;;  %v99_v4 = vld [vmem:[%s444_s3 + $0x70] sm:$0xff]  ;;  %s182_s11 = sshll.u32 %s448_s7, 4  ;;  %s183_s11 = int_to_ptr.hbm [resolvable:$true] %s182_s11 }
   0x8   :  { %105 = vmatpush.msra.mxu1 %v100_v3  ;;  %v45_v5 = vld [vmem:[#allocation2] sm:$0xff]  ;;  %v98_v6 = vld [vmem:[%s444_s3 + $0x68] sm:$0xff]  ;;  %197 = vmatpush.msra.mxu3 %v100_v3  ;;  %v96_v9 = vld [vmem:[%s444_s3 + $0x58] sm:$0xff] }
   0x9   :  { %73 = vmatpush.msra.mxu0 %v47_v1  ;;  %v43_v7 = vld [vmem:[%s441_s0] sm:$0xff]  ;;  %v95_v10 = vld [vmem:[%s444_s3 + $0x50] sm:$0xff]  ;;  %v94_v11 = vld [vmem:[%s444_s3 + $0x48] sm:$0xff] }
   0xa   :  { %106 = vmatpush.msra.mxu1 %v99_v4  ;;  %v97_v8 = vld [vmem:[%s444_s3 + $0x60] sm:$0xff]  ;;  %198 = vmatpush.msra.mxu3 %v99_v4  ;;  %v44_v12 = vld [vmem:[%s441_s0 + $0x8] sm:$0xff]  ;;  %v92_v14 = vld [vmem:[%s444_s3 + $0x38] sm:$0xff] }
   0xb   :  { %74 = vmatpush.msra.mxu0 %v46_v2  ;;  %v93_v13 = vld [vmem:[%s444_s3 + $0x40] sm:$0xff]  ;;  %v91_v15 = vld [vmem:[%s444_s3 + $0x30] sm:$0xff]  ;;  %v90_v16 = vld [vmem:[%s444_s3 + $0x28] sm:$0xff] }
   0xc   :  { %107 = vmatpush.msra.mxu1 %v98_v6  ;;  %199 = vmatpush.msra.mxu3 %v98_v6  ;;  %v89_v17 = vld [vmem:[%s444_s3 + $0x20] sm:$0xff]  ;;  %v88_v18 = vld [vmem:[%s444_s3 + $0x18] sm:$0xff]  ;;  %v87_v19 = vld [vmem:[%s444_s3 + $0x10] sm:$0xff] }
   0xd   :  { %75 = vmatpush.msra.mxu0 %v45_v5  ;;  %v86_v20 = vld [vmem:[%s444_s3 + $0x8] sm:$0xff]  ;;  %v85_v21 = vld [vmem:[%s444_s3] sm:$0xff]  ;;  %v145_v22 = vld [vmem:[%s446_s5 + $0x78] sm:$0xff] }
   0xe   :  { %195 = vmatmul.msk.f32.vlgmr.msra.gmra.mxu0 %vm53_vm0, %v43_v7  ;;  %108 = vmatpush.msra.mxu1 %v97_v8  ;;  %v144_v23 = vld [vmem:[%s446_s5 + $0x70] sm:$0xff]  ;;  %v143_v24 = vld [vmem:[%s446_s5 + $0x68] sm:$0xff]  ;;  %v142_v25 = vld [vmem:[%s446_s5 + $0x60] sm:$0xff] }
   0xf   :  { %200 = vmatpush.msra.mxu3 %v97_v8  ;;  %150 = vmatpush.msra.mxu2 %v145_v22  ;;  %v141_v26 = vld [vmem:[%s446_s5 + $0x58] sm:$0xff]  ;;  %v140_v27 = vld [vmem:[%s446_s5 + $0x50] sm:$0xff]  ;;  %v139_v28 = vld [vmem:[%s446_s5 + $0x48] sm:$0xff] }
  0x10   :  { %109 = vmatpush.msra.mxu1 %v96_v9  ;;  %v138_v29 = vld [vmem:[%s446_s5 + $0x40] sm:$0xff]  ;;  %v137_v30 = vld [vmem:[%s446_s5 + $0x38] sm:$0xff]  ;;  %v136_v32 = vld [vmem:[%s446_s5 + $0x30] sm:$0xff] }
  0x11   :  { %201 = vmatpush.msra.mxu3 %v96_v9  ;;  %151 = vmatpush.msra.mxu2 %v144_v23  ;;  %v217_v31 = vld [vmem:[%s443_s2] ss:$0 sm:$0xff]  ;;  %v135_v33 = vld [vmem:[%s446_s5 + $0x28] sm:$0xff]  ;;  %v133_v38 = vld [vmem:[%s446_s5 + $0x18] sm:$0xff] }
  0x12   :  { %110 = vmatpush.msra.mxu1 %v95_v10  ;;  %v134_v36 = vld [vmem:[%s446_s5 + $0x20] sm:$0xff]  ;;  %v132_v42 = vld [vmem:[%s446_s5 + $0x10] sm:$0xff]  ;;  %v131_v43 = vld [vmem:[%s446_s5 + $0x8] sm:$0xff] }
  0x13   :  { %202 = vmatpush.msra.mxu3 %v95_v10  ;;  %152 = vmatpush.msra.mxu2 %v143_v24  ;;  %v130_v44 = vld [vmem:[%s446_s5] sm:$0xff]  ;;  %s275_s5 = smov [#allocation5]  }
  0x14   :  { %111 = vmatpush.msra.mxu1 %v94_v11  ;;  %v218_v45 = vld [vmem:[%s445_s4] ss:$0 sm:$0xff]  ;;  %s180_s1 = sshll.u32 %s275_s5, 4  ;;  %s181_s1 = int_to_ptr.vmem [resolvable:$true] %s180_s1 }
  0x15   :  { %203 = vmatpush.msra.mxu3 %v94_v11  ;;  %153 = vmatpush.msra.mxu2 %v142_v25  ;;  %v219_v52 = vld [vmem:[%s447_s6] ss:$0 sm:$0xff] }
  0x16   :  { %196 = vmatmul.msk.f32.gmra.mxu0 %vm53_vm0, %v44_v12  ;;  %112 = vmatpush.msra.mxu1 %v93_v13 }
  0x17   :  { %204 = vmatpush.msra.mxu3 %v93_v13  ;;  %154 = vmatpush.msra.mxu2 %v141_v26 }
  0x18   :  { %113 = vmatpush.msra.mxu1 %v92_v14 }
  0x19   :  { %205 = vmatpush.msra.mxu3 %v92_v14  ;;  %155 = vmatpush.msra.mxu2 %v140_v27 }
  0x1a   :  { %114 = vmatpush.msra.mxu1 %v91_v15 }
  0x1b   :  { %206 = vmatpush.msra.mxu3 %v91_v15  ;;  %156 = vmatpush.msra.mxu2 %v139_v28 }
  0x1c   :  { %115 = vmatpush.msra.mxu1 %v90_v16 }
  0x1d   :  { %207 = vmatpush.msra.mxu3 %v90_v16  ;;  %157 = vmatpush.msra.mxu2 %v138_v29 }
  0x1e   :  { %116 = vmatpush.msra.mxu1 %v89_v17 }
  0x1f   :  { %208 = vmatpush.msra.mxu3 %v89_v17  ;;  %158 = vmatpush.msra.mxu2 %v137_v30 }
  0x20   :  { %117 = vmatpush.msra.mxu1 %v88_v18 }
  0x21   :  { %209 = vmatpush.msra.mxu3 %v88_v18  ;;  %159 = vmatpush.msra.mxu2 %v136_v32 }
  0x22   :  { %118 = vmatpush.msra.mxu1 %v87_v19 }
  0x23   :  { %210 = vmatpush.msra.mxu3 %v87_v19  ;;  %160 = vmatpush.msra.mxu2 %v135_v33 }
  0x24   :  { %119 = vmatpush.msra.mxu1 %v86_v20 }
  0x25   :  { %211 = vmatpush.msra.mxu3 %v86_v20  ;;  %161 = vmatpush.msra.mxu2 %v134_v36 }
  0x26   :  { %120 = vmatpush.msra.mxu1 %v85_v21 }
  0x27   :  { %212 = vmatpush.msra.mxu3 %v85_v21  ;;  %162 = vmatpush.msra.mxu2 %v133_v38 }
  0x29   :  { %163 = vmatpush.msra.mxu2 %v132_v42 }
  0x2b   :  { %164 = vmatpush.msra.mxu2 %v131_v43 }
  0x2d   :  { %165 = vmatpush.msra.mxu2 %v130_v44 }
  0x8b   :  { %v77_v34 = vpop.f32.mrf.mxu0 }
  0x8c   :  { %v78_v35 = vadd.f32 %v217_v31, %v77_v34 }
  0x8e   :  { %v83_v37 = vmax.f32 %v78_v35, 0.0 }
  0x90   :  { %121 = vmatmul.f32.vlgmr.msra.gmra.mxu1 %v83_v37 }
  0x93   :  { %v80_v39 = vpop.f32.mrf.mxu0 }
  0x94   :  { %v81_v40 = vadd.f32 %v217_v31, %v80_v39 }
  0x96   :  { %v84_v41 = vmax.f32 %v81_v40, 0.0 }
  0x98   :  { %124 = vmatmul.f32.vlgmr.msra.gmra.mxu3 %v84_v41 }
 0x10d   :  { %v122_v46 = vpop.f32.mrf.mxu1 }
 0x10e   :  { %v123_v47 = vadd.f32 %v218_v45, %v122_v46 }
 0x110   :  { %v128_v48 = vmax.f32 %v123_v47, 0.0 }
 0x112   :  { %166 = vmatmul.f32.vlgmr.msra.gmra.mxu2 %v128_v48 }
 0x11b   :  { %v125_v49 = vpop.f32.mrf.mxu3 }
 0x11c   :  { %v126_v50 = vadd.f32 %v218_v45, %v125_v49 }
 0x11e   :  { %v129_v51 = vmax.f32 %v126_v50, 0.0 }
 0x120   :  { %169 = vmatmul.f32.gmra.mxu2 %v129_v51 }
 0x195   :  { %v167_v53 = vpop.f32.mrf.mxu2 }
 0x196   :  { %v168_v54 = vadd.f32 %v219_v52, %v167_v53 }
 0x198   :  { %174 = vst.msk [vmem:[#allocation5] sm:$0xff] %vm173_vm1, %v168_v54 }
 0x1a3   :  { %v170_v55 = vpop.f32.mrf.mxu2 }
 0x1a4   :  { %v171_v56 = vadd.f32 %v219_v52, %v170_v55 }
 0x1a6   :  { %175 = vst.msk [vmem:[#allocation5 + $0x8] sm:$0xff] %vm173_vm1, %v171_v56 }
 0x1a7   :  { %188 = dma.vmem_to_hbm [thread:$0]  %s181_s1, 256, %s183_s11, [#allocation4], %s273_s29, %s273_s29, %s274_s30  }
 0x1a8   :  { %270 = dma.done.wait [#allocation4], 256  }
 0x1a9   :  { %271 = vsyncadd [#allocation4], 4294967040 }
 0x1aa   :  { %193 = vsyncpa [#allocation3], 1 }
 0x1ab   :  { %194 = vsyncpa [#allocation4], 1 }

</bundles_post_ra>
